<compile_context>
chip_gen: v5e
topology: v5e:2x2
jax: 0.10.0
libtpu: 0.0.40
codegen_flags: <defaults>
</compile_context>

<pallas_src>
import jax
import jax.numpy as jnp
from jax.experimental import pallas as pl
from jax.experimental.pallas import tpu as pltpu


# ---------------------------------------------------------------------------
# Kernel 1: fused GCN_Pool_for_Single scorer (layers=1), batched over all A
#           adjacencies; one grid step per batch element.
# ---------------------------------------------------------------------------
def _gcn_score_kernel(adj_ref, x_ref, w0_ref, b0_ref, ws_ref, bs_ref, o_ref,
                      ax_scr, dn_scr):
    # adj_ref: (A, N, N)   x_ref: (N, D)   w0_ref: (D, D) torch [out, in] layout
    # b0_ref: (1, D)       ws_ref: (1, D)  bs_ref: (1, 1)
    # o_ref:  (1, A*N)     ax_scr: (A*N, D) f32   dn_scr: (A*N, 1) f32
    A, N, _ = adj_ref.shape
    x = x_ref[...]                                           # (N, D) native dtype
    x32 = x.astype(jnp.float32)

    # Stage 1: per-adjacency propagation adj@x (+ x) and row-degree denominator,
    # laid out as one (A*N, D) slab in VMEM scratch.  A is tiny & static -> unrolled.
    for a in range(A):
        adj_a = adj_ref[a]                                   # (N, N)
        ax = jnp.dot(adj_a, x, preferred_element_type=jnp.float32)        # (N, D) f32
        ax_scr[pl.ds(a * N, N), :] = ax + x32                # keep f32 accumulation
        dn_scr[pl.ds(a * N, N), :] = (
            jnp.sum(adj_a.astype(jnp.float32), axis=1, keepdims=True) + 1.0)

    # Stage 2: ONE batched dense layer over all A adjacencies:
    #   W0(Ax) + W0(x) = (Ax + x) @ W0^T + 2*b0 ; then / denom ; relu.
    # At BERT scale (N=512, A=3) this is a 1536-row dot that fills the MXU; at tiny N
    # fold multiple batch elements per grid step instead (v5e target >=128 rows,
    # v6e/v7x >=256).
    s = ax_scr[...]                                          # (A*N, D) f32
    h = jax.lax.dot_general(
        s, w0_ref[...],
        dimension_numbers=(((1,), (1,)), ((), ())),          # contract D_in, torch layout
        preferred_element_type=jnp.float32)                  # (A*N, D) f32
    h = h + 2.0 * b0_ref[...].astype(jnp.float32)
    h = jnp.maximum(h / dn_scr[...], 0.0)
    # TODO(synk): gcn_dropout is identity at inference; training-mode dropout not implemented.

    # Stage 3: linear_output (D -> 1) as a (1,D) x (A*N,D)^T dot so the scores land
    # lane-dense (1, A*N) instead of a masked, 99%-padded (A*N, 1) store.
    score = jax.lax.dot_general(
        ws_ref[...].astype(jnp.float32), h,
        dimension_numbers=(((1,), (1,)), ((), ())),
        preferred_element_type=jnp.float32)                  # (1, A*N)
    o_ref[...] = (score + bs_ref[...]).astype(o_ref.dtype)


def gcn_pool_scores(adj_stack, x, w0, b0, w_score, b_score):
    """adj_stack: [B, A, N, N], x: [B, N, D].  Returns scores [B, A, N] (float32)."""
    B, A, N, _ = adj_stack.shape
    D = x.shape[-1]
    scores = pl.pallas_call(
        _gcn_score_kernel,
        out_shape=jax.ShapeDtypeStruct((B, 1, A * N), jnp.float32),
        grid=(B,),
        in_specs=[
            pl.BlockSpec((pl.Squeezed(), A, N, N), lambda b: (b, 0, 0, 0)),  # all adjs of b
            pl.BlockSpec((pl.Squeezed(), N, D), lambda b: (b, 0, 0)),        # features of b
            pl.BlockSpec((D, D), lambda b: (0, 0)),      # W0 resident across the grid
            pl.BlockSpec((1, D), lambda b: (0, 0)),      # b0 resident
            pl.BlockSpec((1, D), lambda b: (0, 0)),      # linear_output weight resident
            pl.BlockSpec((1, 1), lambda b: (0, 0)),      # linear_output bias resident
        ],
        out_specs=pl.BlockSpec((pl.Squeezed(), 1, A * N), lambda b: (b, 0, 0)),  # lane-dense
        scratch_shapes=[
            pltpu.VMEM((A * N, D), jnp.float32),         # (Ax + x) slab
            pltpu.VMEM((A * N, 1), jnp.float32),         # denom slab
        ],
        compiler_params=pltpu.CompilerParams(
            dimension_semantics=("parallel",)),          # batch splits across v7x's 2 TCs
    )(adj_stack, x, w0, b0.reshape(1, D), w_score.reshape(1, D),
      b_score.astype(jnp.float32).reshape(1, 1))
    return scores.reshape(B, A, N)


# ---------------------------------------------------------------------------
# Kernel 2: linear_transform (x @ W^T + b) with the A-way feature replication
#           fused into the output store (replaces the wrapper concat).
# ---------------------------------------------------------------------------
def _make_linear_transform_kernel(repeat):
    def kernel(x_ref, w_ref, b_ref, o_ref):
        # x_ref: (TILE_M, D_in); w_ref: (D_out, D_in) torch layout; b_ref: (1, D_out)
        acc = jax.lax.dot_general(
            x_ref[...], w_ref[...],
            dimension_numbers=(((1,), (1,)), ((), ())),   # contract D_in, no transpose copy
            preferred_element_type=jnp.float32)
        out = (acc + b_ref[...].astype(jnp.float32)).astype(o_ref.dtype)
        d_out = out.shape[-1]
        for a in range(repeat):                           # fused concat along features
            o_ref[:, pl.ds(a * d_out, d_out)] = out
    return kernel


def linear_transform_replicated(x, w, b, repeat, tile_m=512):
    """x:[B,N,D_in] @ w[D_out,D_in]^T + b, replicated `repeat` times along features
    -> [B, N, repeat*D_out]  (== torch.cat([linear(x)] * repeat, dim=2))."""
    B, N, D_in = x.shape
    D_out = w.shape[0]
    rows = B * N
    tm = min(tile_m, rows)                                 # big, MXU/HBM-friendly row tile
    out2d = pl.pallas_call(
        _make_linear_transform_kernel(repeat),
        out_shape=jax.ShapeDtypeStruct((rows, repeat * D_out), x.dtype),
        grid=(pl.cdiv(rows, tm),),
        in_specs=[
            pl.BlockSpec((tm, D_in), lambda i: (i, 0)),
            pl.BlockSpec((D_out, D_in), lambda i: (0, 0)),   # weight resident across grid
            pl.BlockSpec((1, D_out), lambda i: (0, 0)),      # bias resident across grid
        ],
        out_specs=pl.BlockSpec((tm, repeat * D_out), lambda i: (i, 0)),
        compiler_params=pltpu.CompilerParams(dimension_semantics=("parallel",)),
    )(x.reshape(rows, D_in), w, b.reshape(1, D_out))
    return out2d.reshape(B, N, repeat * D_out)


# ---------------------------------------------------------------------------
# Mask update: clear the union of selected (bottom-K) node indices.
# Done in plain jnp -- a dedicated pallas_call for a (B, N) mask is pure launch
# overhead (perf feedback); XLA fuses the one-hot / any / and.
# ---------------------------------------------------------------------------
def mask_update(src_mask, idx):
    """src_mask: [B,1,N] bool ; idx: [B,A,K] int32.  The torch code mutates one shared
    mask and OR-sums its identical copies, which equals clearing the union of all
    selected indices on the original mask."""
    B, _, N = src_mask.shape
    idx_flat = idx.reshape(B, -1)                                        # (B, A*K)
    sel = jnp.any(idx_flat[:, :, None] == jnp.arange(N)[None, None, :], axis=1)  # (B, N)
    return jnp.logical_and(src_mask, ~sel[:, None, :])


# ---------------------------------------------------------------------------
# SAGPool_Multi.forward
# ---------------------------------------------------------------------------
def sagpool_multi_forward(adj_stack, x, src_mask,
                          w0, b0, w_score, b_score, w_t, b_t, ratio=0.5):
    """Inference forward of SAGPool_Multi.

    adj_stack : [B, A, N, N]  -- adj_list stacked along axis 1
    x         : [B, N, D]
    src_mask  : [B, 1, N] bool
    Returns (adj_stack unchanged, x_out [B,N,A*(D//heads)], src_mask_out [B,1,N]).
    """
    B, A, N, _ = adj_stack.shape

    # 1) score_layer (GCN_Pool_for_Single, layers=1) for every adjacency, one fused kernel.
    scores = gcn_pool_scores(adj_stack, x, w0, b0, w_score, b_score)     # [B, A, N]

    # 2) Top_K with largest=False -> bottom-K node indices per (batch, adj).
    # TODO(synk): no clean Pallas TPU sort/top-k primitive; jax.lax.top_k is used here and
    # its tie-breaking may differ from torch.topk(largest=False, sorted=False).
    K = int(ratio * N) + 1
    _, idx = jax.lax.top_k(-scores, K)                                   # [B, A, K]

    # 3) linear_transform(x) does not depend on adj; computed once with the A-way
    #    feature replication fused into the kernel's output store.
    x_out = linear_transform_replicated(x, w_t, b_t, repeat=A)           # [B, N, A*D_out]

    # 4) mask update (union of selected indices cleared).
    src_mask_out = mask_update(src_mask, idx)

    # adj_list is returned unchanged.
    return adj_stack, x_out, src_mask_out


if __name__ == "__main__":
    # Small shapes consistent with the module: batch=2, nodes(seq)=16,
    # graph_hidden_size=32, heads=3, 3 adjacency matrices, ratio=0.5.
    B, N, D = 2, 16, 32
    heads, A, ratio = 3, 3, 0.5
    D_out = D // heads

    key = jax.random.PRNGKey(0)
    ks = jax.random.split(key, 8)

    x = jax.random.normal(ks[0], (B, N, D), dtype=jnp.float32)
    adj_stack = (jax.random.uniform(ks[1], (B, A, N, N)) < 0.3).astype(jnp.float32)
    src_mask = jnp.ones((B, 1, N), dtype=jnp.bool_).at[0, 0, 3].set(False)

    # GCN_Pool_for_Single params (layers=1): weight_list[0] and linear_output.
    w0 = jax.random.normal(ks[2], (D, D), dtype=jnp.float32) * 0.02
    b0 = jax.random.normal(ks[3], (D,), dtype=jnp.float32) * 0.02
    w_score = jax.random.normal(ks[4], (1, D), dtype=jnp.float32) * 0.02
    b_score = jax.random.normal(ks[5], (1,), dtype=jnp.float32) * 0.02
    # SAGPool_Multi.linear_transform params.
    w_t = jax.random.normal(ks[6], (D_out, D), dtype=jnp.float32) * 0.02
    b_t = jax.random.normal(ks[7], (D_out,), dtype=jnp.float32) * 0.02

    adj_out, x_out, mask_out = sagpool_multi_forward(
        adj_stack, x, src_mask, w0, b0, w_score, b_score, w_t, b_t, ratio)
    adj_out, x_out, mask_out = jax.block_until_ready((adj_out, x_out, mask_out))

    # -------------------- pure-JAX reference checks --------------------
    # References run at HIGHEST precision (scoped per-einsum, not globally); the kernels
    # run native-dtype MXU matmuls with f32 accumulation -> tolerances are modest.
    hp = jax.lax.Precision.HIGHEST

    # a) GCN scorer
    denom = adj_stack.sum(-1, keepdims=True) + 1.0                            # [B,A,N,1]
    ax = jnp.einsum("bain,bnd->baid", adj_stack, x, precision=hp)
    axw = (jnp.einsum("baid,ed->baie", ax, w0, precision=hp) + b0
           + (jnp.einsum("bnd,ed->bne", x, w0, precision=hp) + b0)[:, None])
    g = jax.nn.relu(axw / denom)
    scores_ref = (jnp.einsum("baie,oe->baio", g, w_score, precision=hp) + b_score)[..., 0]
    scores_ker = gcn_pool_scores(adj_stack, x, w0, b0, w_score, b_score)
    assert jnp.allclose(scores_ker, scores_ref, atol=2e-3, rtol=2e-2), "score mismatch"

    # b) linear transform (+ replication along the feature dim)
    x_sel_ref = jnp.einsum("bnd,od->bno", x, w_t, precision=hp) + b_t
    x_ref_out = jnp.concatenate([x_sel_ref] * A, axis=2)
    assert jnp.allclose(x_out, x_ref_out, atol=2e-3, rtol=2e-2), "x mismatch"

    # c) mask update: clear the union of bottom-K indices (same deterministic idx path).
    K = int(ratio * N) + 1
    _, idx_ref = jax.lax.top_k(-scores_ker, K)                                # [B,A,K]
    sel = jnp.zeros((B, N), dtype=bool)
    for a in range(A):
        sel = sel.at[jnp.arange(B)[:, None], idx_ref[:, a]].set(True)
    mask_ref = jnp.logical_and(src_mask, ~sel[:, None, :])
    assert jnp.array_equal(mask_out, mask_ref), "mask mismatch"

    print("KERNEL_OK")
</pallas_src>

<mosaic_0001>
module attributes {stable_mosaic.version = 11 : i64} {
  func.func @_gcn_score_kernel(%arg0: i32, %arg1: memref<1x3x16x16xf32, #tpu.memory_space<vmem>>, %arg2: memref<1x16x32xf32, #tpu.memory_space<vmem>>, %arg3: memref<32x32xf32, #tpu.memory_space<vmem>>, %arg4: memref<1x32xf32, #tpu.memory_space<vmem>>, %arg5: memref<1x32xf32, #tpu.memory_space<vmem>>, %arg6: memref<1x1xf32, #tpu.memory_space<vmem>>, %arg7: memref<1x1x48xf32, #tpu.memory_space<vmem>>, %arg8: memref<48x32xf32, #tpu.memory_space<vmem>>, %arg9: memref<48x1xf32, #tpu.memory_space<vmem>>) attributes {dimension_semantics = [#tpu.dimension_semantics<parallel>], iteration_bounds = array<i64: 2>, scalar_prefetch = 0 : i64, scratch_operands = 2 : i64, tpu.core_type = #tpu.core_type<tc>, window_params = [{transform_indices = @transform_0, window_bounds = array<i64: 1, 3, 16, 16>}, {transform_indices = @transform_1, window_bounds = array<i64: 1, 16, 32>}, {pipeline_mode = #tpu.pipeline_mode<synchronous>, transform_indices = @transform_2, window_bounds = array<i64: 32, 32>}, {pipeline_mode = #tpu.pipeline_mode<synchronous>, transform_indices = @transform_3, window_bounds = array<i64: 1, 32>}, {pipeline_mode = #tpu.pipeline_mode<synchronous>, transform_indices = @transform_4, window_bounds = array<i64: 1, 32>}, {pipeline_mode = #tpu.pipeline_mode<synchronous>, transform_indices = @transform_5, window_bounds = array<i64: 1, 1>}, {transform_indices = @transform_6, window_bounds = array<i64: 1, 1, 48>}]} {
    %c0 = arith.constant 0 : index
    %c0_0 = arith.constant 0 : index
    %c0_1 = arith.constant 0 : index
    %0 = vector.load %arg2[%c0, %c0_0, %c0_1] : memref<1x16x32xf32, #tpu.memory_space<vmem>>, vector<1x16x32xf32>
    %1 = vector.shape_cast %0 : vector<1x16x32xf32> to vector<16x32xf32>
    %c0_2 = arith.constant 0 : index
    %c0_3 = arith.constant 0 : index
    %c0_4 = arith.constant 0 : index
    %c0_5 = arith.constant 0 : index
    %2 = vector.load %arg1[%c0_2, %c0_3, %c0_4, %c0_5] : memref<1x3x16x16xf32, #tpu.memory_space<vmem>>, vector<1x1x16x16xf32>
    %3 = vector.shape_cast %2 : vector<1x1x16x16xf32> to vector<16x16xf32>
    %cst = arith.constant dense<0.000000e+00> : vector<16x32xf32>
    %4 = tpu.matmul %3, %1, %cst {dimension_numbers = #tpu.dot_dimension_numbers<[1], [0], [0], [1], [0, 0, 1, 1], [], []>} : vector<16x16xf32>, vector<16x32xf32>, vector<16x32xf32> -> vector<16x32xf32>
    %5 = arith.addf %4, %1 : vector<16x32xf32>
    %c0_6 = arith.constant 0 : index
    %c0_7 = arith.constant 0 : index
    %6 = vector.load %arg8[%c0_6, %c0_7] : memref<48x32xf32, #tpu.memory_space<vmem>>, vector<16x32xf32>
    tpu.vector_store %arg8[%c0_6, %c0_7], %5 {strides = array<i32>} : memref<48x32xf32, #tpu.memory_space<vmem>>, vector<16x32xf32>,
    %cst_8 = arith.constant dense<0.000000e+00> : vector<16xf32>
    %7 = vector.multi_reduction <add>, %3, %cst_8 [1] : vector<16x16xf32> to vector<16xf32>
    %8 = vector.shape_cast %7 : vector<16xf32> to vector<16x1xf32>
    %cst_9 = arith.constant 1.000000e+00 : f32
    %9 = vector.broadcast %cst_9 : f32 to vector<16x1xf32>
    %10 = arith.addf %8, %9 : vector<16x1xf32>
    %c0_10 = arith.constant 0 : index
    %c0_11 = arith.constant 0 : index
    %11 = vector.load %arg9[%c0_10, %c0_11] : memref<48x1xf32, #tpu.memory_space<vmem>>, vector<16x1xf32>
    tpu.vector_store %arg9[%c0_10, %c0_11], %10 {strides = array<i32>} : memref<48x1xf32, #tpu.memory_space<vmem>>, vector<16x1xf32>,
    %c0_12 = arith.constant 0 : index
    %c1 = arith.constant 1 : index
    %c0_13 = arith.constant 0 : index
    %c0_14 = arith.constant 0 : index
    %12 = vector.load %arg1[%c0_12, %c1, %c0_13, %c0_14] : memref<1x3x16x16xf32, #tpu.memory_space<vmem>>, vector<1x1x16x16xf32>
    %13 = vector.shape_cast %12 : vector<1x1x16x16xf32> to vector<16x16xf32>
    %cst_15 = arith.constant dense<0.000000e+00> : vector<16x32xf32>
    %14 = tpu.matmul %13, %1, %cst_15 {dimension_numbers = #tpu.dot_dimension_numbers<[1], [0], [0], [1], [0, 0, 1, 1], [], []>} : vector<16x16xf32>, vector<16x32xf32>, vector<16x32xf32> -> vector<16x32xf32>
    %15 = arith.addf %14, %1 : vector<16x32xf32>
    %c16 = arith.constant 16 : index
    %c0_16 = arith.constant 0 : index
    %16 = vector.load %arg8[%c16, %c0_16] : memref<48x32xf32, #tpu.memory_space<vmem>>, vector<16x32xf32>
    tpu.vector_store %arg8[%c16, %c0_16], %15 {strides = array<i32>} : memref<48x32xf32, #tpu.memory_space<vmem>>, vector<16x32xf32>,
    %cst_17 = arith.constant dense<0.000000e+00> : vector<16xf32>
    %17 = vector.multi_reduction <add>, %13, %cst_17 [1] : vector<16x16xf32> to vector<16xf32>
    %18 = vector.shape_cast %17 : vector<16xf32> to vector<16x1xf32>
    %cst_18 = arith.constant 1.000000e+00 : f32
    %19 = vector.broadcast %cst_18 : f32 to vector<16x1xf32>
    %20 = arith.addf %18, %19 : vector<16x1xf32>
    %c16_19 = arith.constant 16 : index
    %c0_20 = arith.constant 0 : index
    %21 = vector.load %arg9[%c16_19, %c0_20] : memref<48x1xf32, #tpu.memory_space<vmem>>, vector<16x1xf32>
    tpu.vector_store %arg9[%c16_19, %c0_20], %20 {strides = array<i32>} : memref<48x1xf32, #tpu.memory_space<vmem>>, vector<16x1xf32>,
    %c0_21 = arith.constant 0 : index
    %c2 = arith.constant 2 : index
    %c0_22 = arith.constant 0 : index
    %c0_23 = arith.constant 0 : index
    %22 = vector.load %arg1[%c0_21, %c2, %c0_22, %c0_23] : memref<1x3x16x16xf32, #tpu.memory_space<vmem>>, vector<1x1x16x16xf32>
    %23 = vector.shape_cast %22 : vector<1x1x16x16xf32> to vector<16x16xf32>
    %cst_24 = arith.constant dense<0.000000e+00> : vector<16x32xf32>
    %24 = tpu.matmul %23, %1, %cst_24 {dimension_numbers = #tpu.dot_dimension_numbers<[1], [0], [0], [1], [0, 0, 1, 1], [], []>} : vector<16x16xf32>, vector<16x32xf32>, vector<16x32xf32> -> vector<16x32xf32>
    %25 = arith.addf %24, %1 : vector<16x32xf32>
    %c32 = arith.constant 32 : index
    %c0_25 = arith.constant 0 : index
    %26 = vector.load %arg8[%c32, %c0_25] : memref<48x32xf32, #tpu.memory_space<vmem>>, vector<16x32xf32>
    tpu.vector_store %arg8[%c32, %c0_25], %25 {strides = array<i32>} : memref<48x32xf32, #tpu.memory_space<vmem>>, vector<16x32xf32>,
    %cst_26 = arith.constant dense<0.000000e+00> : vector<16xf32>
    %27 = vector.multi_reduction <add>, %23, %cst_26 [1] : vector<16x16xf32> to vector<16xf32>
    %28 = vector.shape_cast %27 : vector<16xf32> to vector<16x1xf32>
    %cst_27 = arith.constant 1.000000e+00 : f32
    %29 = vector.broadcast %cst_27 : f32 to vector<16x1xf32>
    %30 = arith.addf %28, %29 : vector<16x1xf32>
    %c32_28 = arith.constant 32 : index
    %c0_29 = arith.constant 0 : index
    %31 = vector.load %arg9[%c32_28, %c0_29] : memref<48x1xf32, #tpu.memory_space<vmem>>, vector<16x1xf32>
    tpu.vector_store %arg9[%c32_28, %c0_29], %30 {strides = array<i32>} : memref<48x1xf32, #tpu.memory_space<vmem>>, vector<16x1xf32>,
    %c0_30 = arith.constant 0 : index
    %c0_31 = arith.constant 0 : index
    %32 = vector.load %arg8[%c0_30, %c0_31] : memref<48x32xf32, #tpu.memory_space<vmem>>, vector<48x32xf32>
    %c0_32 = arith.constant 0 : index
    %c0_33 = arith.constant 0 : index
    %33 = vector.load %arg3[%c0_32, %c0_33] : memref<32x32xf32, #tpu.memory_space<vmem>>, vector<32x32xf32>
    %cst_34 = arith.constant dense<0.000000e+00> : vector<48x32xf32>
    %34 = tpu.matmul %32, %33, %cst_34 {dimension_numbers = #tpu.dot_dimension_numbers<[1], [1], [0], [0], [0, 0, 1, 0], [], []>} : vector<48x32xf32>, vector<32x32xf32>, vector<48x32xf32> -> vector<48x32xf32>
    %c0_35 = arith.constant 0 : index
    %c0_36 = arith.constant 0 : index
    %35 = vector.load %arg4[%c0_35, %c0_36] : memref<1x32xf32, #tpu.memory_space<vmem>>, vector<1x32xf32>
    %cst_37 = arith.constant 2.000000e+00 : f32
    %36 = vector.broadcast %cst_37 : f32 to vector<1x32xf32>
    %37 = arith.mulf %36, %35 : vector<1x32xf32>
    %38 = vector.broadcast %37 : vector<1x32xf32> to vector<48x32xf32>
    %39 = arith.addf %34, %38 : vector<48x32xf32>
    %c0_38 = arith.constant 0 : index
    %c0_39 = arith.constant 0 : index
    %40 = vector.load %arg9[%c0_38, %c0_39] : memref<48x1xf32, #tpu.memory_space<vmem>>, vector<48x1xf32>
    %41 = vector.broadcast %40 : vector<48x1xf32> to vector<48x32xf32>
    %42 = arith.divf %39, %41 : vector<48x32xf32>
    %cst_40 = arith.constant 0.000000e+00 : f32
    %43 = vector.broadcast %cst_40 : f32 to vector<48x32xf32>
    %44 = arith.maximumf %42, %43 : vector<48x32xf32>
    %c0_41 = arith.constant 0 : index
    %c0_42 = arith.constant 0 : index
    %45 = vector.load %arg5[%c0_41, %c0_42] : memref<1x32xf32, #tpu.memory_space<vmem>>, vector<1x32xf32>
    %cst_43 = arith.constant dense<0.000000e+00> : vector<1x48xf32>
    %46 = tpu.matmul %45, %44, %cst_43 {dimension_numbers = #tpu.dot_dimension_numbers<[1], [1], [0], [0], [0, 0, 1, 0], [], []>} : vector<1x32xf32>, vector<48x32xf32>, vector<1x48xf32> -> vector<1x48xf32>
    %c0_44 = arith.constant 0 : index
    %c0_45 = arith.constant 0 : index
    %47 = vector.load %arg6[%c0_44, %c0_45] : memref<1x1xf32, #tpu.memory_space<vmem>>, vector<1x1xf32>
    %48 = vector.broadcast %47 : vector<1x1xf32> to vector<1x48xf32>
    %49 = arith.addf %46, %48 : vector<1x48xf32>
    %c0_46 = arith.constant 0 : index
    %c0_47 = arith.constant 0 : index
    %c0_48 = arith.constant 0 : index
    %50 = vector.load %arg7[%c0_46, %c0_47, %c0_48] : memref<1x1x48xf32, #tpu.memory_space<vmem>>, vector<1x1x48xf32>
    %51 = vector.shape_cast %50 : vector<1x1x48xf32> to vector<1x48xf32>
    %52 = vector.shape_cast %49 : vector<1x48xf32> to vector<1x1x48xf32>
    tpu.vector_store %arg7[%c0_46, %c0_47, %c0_48], %52 {strides = array<i32>} : memref<1x1x48xf32, #tpu.memory_space<vmem>>, vector<1x1x48xf32>,
    return
  }
  func.func @transform_0(%arg0: i32) -> (i32, i32, i32, i32) {
    %c0_i32 = arith.constant 0 : i32
    %c0_i32_0 = arith.constant 0 : i32
    %c0_i32_1 = arith.constant 0 : i32
    %c0_i32_2 = arith.constant 0 : i32
    return %arg0, %c0_i32, %c0_i32_0, %c0_i32_1 : i32, i32, i32, i32
  }
  func.func @transform_1(%arg0: i32) -> (i32, i32, i32) {
    %c0_i32 = arith.constant 0 : i32
    %c0_i32_0 = arith.constant 0 : i32
    %c0_i32_1 = arith.constant 0 : i32
    return %arg0, %c0_i32, %c0_i32_0 : i32, i32, i32
  }
  func.func @transform_2(%arg0: i32) -> (i32, i32) {
    %c0_i32 = arith.constant 0 : i32
    %c0_i32_0 = arith.constant 0 : i32
    %c0_i32_1 = arith.constant 0 : i32
    return %c0_i32, %c0_i32_0 : i32, i32
  }
  func.func @transform_3(%arg0: i32) -> (i32, i32) {
    %c0_i32 = arith.constant 0 : i32
    %c0_i32_0 = arith.constant 0 : i32
    %c0_i32_1 = arith.constant 0 : i32
    return %c0_i32, %c0_i32_0 : i32, i32
  }
  func.func @transform_4(%arg0: i32) -> (i32, i32) {
    %c0_i32 = arith.constant 0 : i32
    %c0_i32_0 = arith.constant 0 : i32
    %c0_i32_1 = arith.constant 0 : i32
    return %c0_i32, %c0_i32_0 : i32, i32
  }
  func.func @transform_5(%arg0: i32) -> (i32, i32) {
    %c0_i32 = arith.constant 0 : i32
    %c0_i32_0 = arith.constant 0 : i32
    %c0_i32_1 = arith.constant 0 : i32
    return %c0_i32, %c0_i32_0 : i32, i32
  }
  func.func @transform_6(%arg0: i32) -> (i32, i32, i32) {
    %c0_i32 = arith.constant 0 : i32
    %c0_i32_0 = arith.constant 0 : i32
    %c0_i32_1 = arith.constant 0 : i32
    return %arg0, %c0_i32, %c0_i32_0 : i32, i32, i32
  }
}

</mosaic_0001>

<bundles_post_ra>
// kernel: tpu_custom_call.1
= control target key start
LH: loop header
LB: loop body
LE: loop exit
PB: predicated region body
PF: predicated region fallthrough
CT: control target
= control target key end

     0   :  { %s1565_s0 = inlined_call_operand.hbm [shape: f32[2,3,16,16], index: 0, kind: input, shape index: {}]   ;;  %s1566_s1 = inlined_call_operand.hbm [shape: f32[2,16,32], index: 1, kind: input, shape index: {}]   ;;  %s1567_s2 = inlined_call_operand.hbm [shape: f32[32,32], index: 2, kind: input, shape index: {}]   ;;  %s1568_s3 = inlined_call_operand.vmem [shape: f32[1,32], index: 3, kind: input, shape index: {}]   ;;  %s1569_s4 = inlined_call_operand.vmem [shape: f32[1,32], index: 4, kind: input, shape index: {}]   ;;  %s1570_s5 = inlined_call_operand.<no memory space> [shape: f32[1,1], index: 5, kind: input, shape index: {}]   ;;  %s1571_s6 = inlined_call_operand.hbm [shape: f32[2,1,48], index: 6, kind: output, shape index: {}]  }
   0x1   :  { %1579 = sst [smem:[#allocation19_spill]] %s1565_s0  ;;  %v11_v0 = vstv %s1570_s5 }
   0x2   :  { %1580 = sst [smem:[#allocation20_spill]] %s1567_s2  ;;  %12 = vst [vmem:[#allocation4] sm:$0x1] %v11_v0 }
   0x3   :  { %13 = vsyncpa [#allocation6], 0 }
   0x4   :  { %15 = vsyncpa [#allocation6 + $0x1], 0 }
   0x5   :  { %16 = vsyncpa [#allocation9], 0 }
   0x6   :  { %18 = vsyncpa [#allocation9 + $0x1], 0 }
   0x7   :  { %19 = vsyncpa [#allocation7], 0 }
   0x8   :  { %21 = vsyncpa [#allocation7 + $0x1], 0  ;;  %s1181_s23 = smov 0   ;;  %s1183_s24 = smov 0  }
   0x9   :  { %s1185_s25 = smov 0   ;;  %s1187_s26 = smov 0  }
   0xa LB: > { %1581 = sst [smem:[#allocation16_spill]] %s1133_s25  ;;  %s1202_s5 = sadd.s32 4294967295, %s1137_s26   ;;  %s1137_s26 = sphi %s1187_s26, %s1608_s26   ;;  %s1133_s25 = sphi %s1185_s25, %s1610_s25   ;;  %s1129_s24 = sphi %s1183_s24, %s1612_s24   ;;  %s1125_s23 = sphi %s1181_s23, %s1611_s23  }
   0xb   : > { %s841_s27 = sadd.s32 4294967294, %s1137_s26   ;;  %p47_p0 = scmp.ne.s32.totalorder %s1129_s24, %s1125_s23 }
   0xc   : > { %p48_p1 = scmp.eq.s32.totalorder %s1202_s5, 0  ;;  %p181_p2 = scmp.eq.s32.totalorder %s1202_s5, 1 }
   0xd   : > { %p187_p3 = scmp.eq.s32.totalorder %s841_s27, 1  ;;  %p842_p5 = scmp.ge.s32.totalorder %s1137_s26, 1 }
   0xe   : > { %p1211_p4 = por %p48_p1, %p47_p0  ;;  %p194_p7 = scmp.lt.s32.totalorder %s1137_s26, 3 }
   0xf   : > { %p1216_p6 = por %p187_p3, %p47_p0  ;;  %s1584_s2 = sld [smem:[#allocation20_spill]] }
  0x10   : > { %p1224_p8 = pnand %p842_p5, %p194_p7  ;;  %s1139_s10 = smov [#allocation10]  }
  0x11   : > { %s207_s11 = sshll.u32 %s1139_s10, 4  ;;  %s1234_s12 = sadd.s32 1, %s1137_s26   ;;  %s208_s11 = int_to_ptr.vmem [resolvable:$true] %s207_s11 }
  0x12   : > { %p903_p9 = pneg %p1224_p8  ;;  %1586 = sst [smem:[#allocation17_spill]] %s1234_s12 }
  0x13   : > { %s1572_s13 = smov 128   ;;  %s1574_s14 = smov 8  }
  0x14   : > { %p904_p10 = pnand %p903_p9, %p48_p1  ;;  %s31_s15 = ssub.s32 %s1137_s26, %s1234_s12 }
  0x15   : > { %s205_s8 = sshll.u32 %s1584_s2, 4  ;;  %s34_s16 = sadd.s32 1, %s1133_s25  ;;  %s206_s8 = int_to_ptr.hbm [resolvable:$true] %s205_s8 }
  0x16   : > { %906 = dma.hbm_to_vmem [thread:$0]  (!%p904_p10), %s206_s8, 512, %s208_s11, [#allocation9], %s1572_s13, %s1572_s13, %s1574_s14  }
  0x17   : > { %p32_p12 = scmp.eq.s32.totalorder %s31_s15, 0  ;;  %p41_p13 = scmp.ne.s32.totalorder %s1133_s25, %s1129_s24 }
  0x18   : > { %p42_p0 = scmp.eq.s32.totalorder %s1137_s26, 0  ;;  %p919_p3 = scmp.lt.s32.totalorder %s1137_s26, 2 }
  0x19   : > { %s1247_s17 = scalar_select %p32_p12, %s1133_s25, %s34_s16  }
  0x1a   : > { %p43_p5 = por %p42_p0, %p41_p13  ;;  %p1251_p7 = por %p181_p2, %p41_p13 }
  0x1b   : > { %1587 = sst [smem:[#allocation18_spill]] %s1247_s17  ;;  %s1256_s19 = sand.u32 1, %s1133_s25  }
  0x1c   : > { %s891_s20 = smul.u32 48, %s1137_s26  ;;  %s1589_s0 = sld [smem:[#allocation19_spill]] }
  0x1d   : > { %s890_s21 = smul.u32 48, %s1256_s19  ;;  %p1263_p9 = pnand %p919_p3, %p43_p5 }
  0x1e   : > { %s231_s15 = scalar_lea.sflag [#allocation6], %s1256_s19 }
  0x1f   : > { %s234_s10 = scalar_lea.vmem [#allocation5], %s890_s21  ;;  %p1007_p10 = pneg %p1263_p9 }
  0x20   : > { %s242_s11 = sshll.u32 %s234_s10, 4  ;;  %s243_s11 = int_to_ptr.vmem [resolvable:$true] %s242_s11 }
  0x22   : > { %s239_s30 = scalar_lea.hbm %s1589_s0, %s891_s20  ;;  %s1010_s27 = scalar_lea.hbm %s1589_s0, 96 }
  0x23   : > { %s240_s8 = sshll.u32 %s239_s30, 4  ;;  %s241_s8 = int_to_ptr.hbm [resolvable:$true] %s240_s8 }
  0x24   : > { %s1003_s16 = sshra.s32 %s241_s8, 4  ;;  %s1004_s16 = int_to_ptr.hbm [resolvable:$true] %s1003_s16 }
  0x25   : > { %s1005_s13 = scalar_lea.hbm %s1004_s16, 48  ;;  %p1011_p0 = scmp.lt.s32.totalorder %s1004_s16, %s1589_s0 }
  0x26   : > { %p1006_p2 = scmp.ne.s32.totalorder %s1004_s16, %s1005_s13  ;;  %p1012_p3 = scmp.lt.s32.totalorder %s1010_s27, %s1005_s13 }
  0x28   : > { %p1008_p12 = pnand %p1007_p10, %p1006_p2  ;;  %p1013_p5 = por %p1012_p3, %p1011_p0 }
  0x2a   : > { %p1009_p13 = pneg %p1008_p12 }
  0x2c   : > { %p1014_p11 = pnand %p1013_p5, %p1009_p13 }
  0x2e   : > { %1017 = shalt.err (!%p1014_p11)
}
  0x2f   : > { %s1591_s21 = smov 8   ;;  %s1592_s10 = smov 128  }
  0x30   : > { %910 = dma.hbm_to_vmem [thread:$0]  (!%p1263_p9), %s241_s8, 768, %s243_s11, %s231_s15, %s1592_s10, %s1592_s10, %s1591_s21  }
  0x31   : > { %s252_s20 = sand.u32 1, %s1137_s26   ;;  %s846_s22 = sshll.u32 %s1256_s19, 4 }
  0x32   : > { %s881_s2 = sshll.u32 %s1137_s26, 4  ;;  %s256_s17 = scalar_lea.vmem [#allocation8], %s846_s22 }
  0x33   : > { %s264_s14 = sshll.u32 %s256_s17, 4  ;;  %s261_s27 = scalar_lea.hbm %s1566_s1, %s881_s2  ;;  %s265_s14 = int_to_ptr.vmem [resolvable:$true] %s264_s14 }
  0x34   : > { %s262_s30 = sshll.u32 %s261_s27, 4  ;;  %s253_s0 = scalar_lea.sflag [#allocation9], %s252_s20  ;;  %s263_s30 = int_to_ptr.hbm [resolvable:$true] %s262_s30 }
  0x35   : > { %s1033_s25 = sshra.s32 %s263_s30, 4  ;;  %s1040_s17 = scalar_lea.hbm %s1566_s1, 32  ;;  %s1034_s25 = int_to_ptr.hbm [resolvable:$true] %s1033_s25 }
  0x36   : > { %s1035_s12 = scalar_lea.hbm %s1034_s25, 16  ;;  %p1041_p13 = scmp.lt.s32.totalorder %s1034_s25, %s1566_s1 }
  0x37   : > { %p1036_p11 = scmp.ne.s32.totalorder %s1034_s25, %s1035_s12  ;;  %p1042_p0 = scmp.lt.s32.totalorder %s1040_s17, %s1035_s12 }
  0x39   : > { %p1038_p2 = pnand %p1036_p11, %p1007_p10  ;;  %p1043_p3 = por %p1042_p0, %p1041_p13 }
  0x3b   : > { %p1039_p12 = pneg %p1038_p2 }
  0x3d   : > { %p1044_p5 = pnand %p1043_p3, %p1039_p12 }
  0x3f   : > { %1047 = shalt.err (!%p1044_p5)
}
  0x40   : > { %913 = dma.hbm_to_vmem [thread:$0]  (!%p1263_p9), %s263_s30, 256, %s265_s14, %s253_s0, %s1592_s10, %s1592_s10, %s1591_s21  }
  0x41   : > { %276 = sbr.rel (%p1224_p8) target bundleno = 533 (0x215), region = 44  ;;  %s1307_s2 = sand.u32 (!%p1224_p8), 1, %s1129_s24  }
  0x42   : > { %s892_s25 = smul.u32 (!%p1224_p8), 48, %s1307_s2  ;;  %s279_s12 = scalar_lea.sflag (!%p1224_p8), [#allocation6], %s1307_s2 }
  0x44   : > { %s282_s20 = scalar_lea.vmem (!%p1224_p8), [#allocation5], %s892_s25 }
  0x46   : > { %1108 = dma.done.wait (%p1211_p4), %s279_s12, 768  }
  0x47   : > { %1110 = vsyncadd (%p1211_p4), %s279_s12, 4294966528  ;;  %s288_s0 = sand.u32 1, %s1202_s5   ;;  %s850_s9 = sshll.u32 %s1307_s2, 4 }
  0x48   : > { %s289_s7 = scalar_lea.sflag [#allocation9], %s288_s0  ;;  %s292_s21 = scalar_lea.vmem [#allocation8], %s850_s9 }
  0x49   : > { %1112 = dma.done.wait (%p1211_p4), %s289_s7, 256  }
  0x4a   : > { %1114 = vsyncadd (%p1211_p4), %s289_s7, 4294967040 }
  0x4b   : > { %1116 = dma.done.wait (%p48_p1), [#allocation9], 512  }
  0x4c   : > { %1118 = vsyncadd (%p48_p1), [#allocation9], 4294966784  ;;  %v1325_v1 = vld [vmem:[%s292_s21 + $0x8] sm:$0xff]  ;;  %v1327_v2 = vld [vmem:[%s292_s21] sm:$0xff]  ;;  %vm335_vm0 = vcmask 130048   ;;  %vm365_vm1 = vcmask 261120   ;;  %s739_s27 = scalar_lea.hbm %s1571_s6, %s1202_s5 }
  0x4d   : > { %356 = vmatpush.msra.mxu0 %v1325_v1  ;;  %402 = vmatpush.msra.mxu1 %v1325_v1  ;;  %v333_v3 = vld [vmem:[%s282_s20] sm:$0xff]  ;;  %v854_v4 = vld [vmem:[%s282_s20 + $0x10] sm:$0xff]  ;;  %v334_v5 = vld [vmem:[%s282_s20 + $0x8] sm:$0xff]  ;;  %v1142_v19 = vmov 0   ;;  %vm376_vm2 = vcmask 7168   ;;  %s330_s30 = scalar_lea.vmem [#allocation11], %s1307_s2 }
  0x4e   : > { %446 = vmatpush.msra.mxu2 %v1325_v1  ;;  %v859_v6 = vld [vmem:[%s282_s20 + $0x28] sm:$0xff]  ;;  %v855_v7 = vld [vmem:[%s282_s20 + $0x18] sm:$0xff]  ;;  %v858_v8 = vld [vmem:[%s282_s20 + $0x20] sm:$0xff]  ;;  %v371_v10 = vsel %vm335_vm0, %v334_v5, 0.0  ;;  %v368_v13 = vsel %vm335_vm0, %v333_v3, 0.0  ;;  %v413_v14 = vsel %vm335_vm0, %v854_v4, 0.0  ;;  %959 = vset.pattern.permute.xlu1 %v1142_v19 }
  0x4f   : > { %357 = vmatpush.msra.mxu0 %v1327_v2  ;;  %403 = vmatpush.msra.mxu1 %v1327_v2  ;;  %v460_v9 = vsel %vm335_vm0, %v859_v6, 0.0  ;;  %v416_v11 = vsel %vm335_vm0, %v855_v7, 0.0  ;;  %v457_v12 = vsel %vm335_vm0, %v858_v8, 0.0  ;;  %v476_v15 = vld [vmem:[#allocation10 + $0x18] sm:$0xff]  ;;  %v475_v16 = vld [vmem:[#allocation10 + $0x10] sm:$0xff]  ;;  %v474_v17 = vld [vmem:[#allocation10 + $0x8] sm:$0xff] }
  0x50   : > { %852 = vmatmul.msk.f32.vlgmr.msra.gmra.mxu0 %vm335_vm0, %v333_v3  ;;  %856 = vmatmul.msk.f32.vlgmr.msra.gmra.mxu1 %vm335_vm0, %v854_v4  ;;  %v473_v18 = vld [vmem:[#allocation10] sm:$0xff]  ;;  %v680_v53 = vld [vmem:[#allocation4] sm:$0x1]  ;;  %s741_s19 = sshll.u32 %s330_s30, 4  ;;  %s743_s8 = sshll.u32 %s739_s27, 4  ;;  %s742_s19 = int_to_ptr.vmem [resolvable:$true] %s741_s19  ;;  %s744_s8 = int_to_ptr.hbm [resolvable:$true] %s743_s8 }
  0x51   : > { %447 = vmatpush.msra.mxu2 %v1327_v2  ;;  %461 = vadd.xlane.f32.xlu0 %v460_v9  ;;  %s731_s17 = scalar_lea.sflag [#allocation7], %s1307_s2  ;;  %s1077_s11 = sshra.s32 %s744_s8, 4  ;;  %s1078_s11 = int_to_ptr.hbm [resolvable:$true] %s1077_s11 }
  0x52   : > { %860 = vmatmul.msk.f32.vlgmr.msra.gmra.mxu2 %vm335_vm0, %v858_v8  ;;  %372 = vadd.xlane.f32.xlu2 %v371_v10  ;;  %s1079_s15 = scalar_lea.hbm %s1078_s11, 1  ;;  %s1083_s12 = scalar_lea.hbm %s1571_s6, 2 }
  0x53   : > { %417 = vadd.xlane.f32.xlu1 %v416_v11  ;;  %882 = vmatpush.xpose.msk.msrb.mxu2 %vm365_vm1, %v476_v15  ;;  %v477_v11 = vld [vmem:[%s1568_s3] sm:$0x1]  ;;  %p1080_p1 = scmp.ne.s32.totalorder %s1078_s11, %s1079_s15  ;;  %p1084_p9 = scmp.lt.s32.totalorder %s1078_s11, %s1571_s6 }
  0x54   : > { %883 = vmatpush.xpose.msk.msra.mxu3 %vm365_vm1, %v476_v15  ;;  %862 = vmatpush.xpose.msk.msrb.mxu1 %vm365_vm1, %v476_v15  ;;  %p1085_p10 = scmp.lt.s32.totalorder %s1083_s12, %s1079_s15 }
  0x55   : > { %958 = vset.pattern.permute.xlu0 %v1142_v19  ;;  %960 = vset.pattern.permute.xlu2 %v1142_v19  ;;  %p1081_p4 = pnand %p1080_p1, %p1251_p7 }
  0x56   : > { %p1086_p11 = por %p1085_p10, %p1084_p9 }
  0x57   : > { %884 = vmatpush.xpose.msk.msrb.mxu2 %vm365_vm1, %v475_v16  ;;  %p1082_p8 = pneg %p1081_p4 }
  0x58   : > { %853 = vmatmul.msk.f32.gmra.mxu0 %vm335_vm0, %v334_v5  ;;  %857 = vmatmul.msk.f32.gmra.mxu1 %vm335_vm0, %v855_v7 }
  0x59   : > { %458 = vadd.xlane.f32.xlu0 %v457_v12  ;;  %885 = vmatpush.xpose.msk.msra.mxu3 %vm365_vm1, %v475_v16  ;;  %p1087_p2 = pnand %p1086_p11, %p1082_p8 }
  0x5a   : > { %861 = vmatmul.msk.f32.gmra.mxu2 %vm335_vm0, %v859_v6  ;;  %369 = vadd.xlane.f32.xlu2 %v368_v13 }
  0x5b   : > { %414 = vadd.xlane.f32.xlu1 %v413_v14  ;;  %863 = vmatpush.xpose.msk.msrb.mxu1 %vm365_vm1, %v475_v16 }
  0x5c   : > { %886 = vmatpush.xpose.msk.msrb.mxu2 %vm365_vm1, %v474_v17 }
  0x5d   : > { %887 = vmatpush.xpose.msk.msra.mxu3 %vm365_vm1, %v474_v17 }
  0x5f   : > { %864 = vmatpush.xpose.msk.msrb.mxu1 %vm365_vm1, %v474_v17 }
  0x60   : > { %888 = vmatpush.xpose.msk.msrb.mxu2 %vm365_vm1, %v473_v18 }
  0x61   : > { %889 = vmatpush.xpose.msk.msra.mxu3 %vm365_vm1, %v473_v18 }
  0x63   : > { %865 = vmatpush.xpose.msk.msrb.mxu1 %vm365_vm1, %v473_v18  ;;  %v478_v18 = vmul.f32 2.0, %v477_v11 }
  0xc4   : > { %v462_v20 = vpop.xlane.xlu0 %461 }
  0xc5   : > { %v464_v21 = vadd.f32 1.0, %v462_v20  ;;  %v373_v22 = vpop.xlane.xlu2 %372 }
  0xc6   : > { %v375_v23 = vadd.f32 1.0, %v373_v22  ;;  %v418_v24 = vpop.xlane.xlu1 %417 }
  0xc7   : > { %466 = vst.msk [vmem:[#allocation3 + $0x28] sm:$0xff] %vm376_vm2, %v464_v21  ;;  %v420_v25 = vadd.f32 1.0, %v418_v24 }
  0xc8   : > { %378 = vst.msk [vmem:[#allocation3 + $0x8] sm:$0xff] %vm376_vm2, %v375_v23 }
  0xc9   : > { %422 = vst.msk [vmem:[#allocation3 + $0x18] sm:$0xff] %vm376_vm2, %v420_v25 }
  0xcc   : > { %v459_v26 = vpop.xlane.xlu0 %458 }
  0xcd   : > { %v359_v27 = vpop.f32.mrf.mxu0  ;;  %v405_v28 = vpop.f32.mrf.mxu1  ;;  %v463_v29 = vadd.f32 1.0, %v459_v26 }
  0xce   : > { %v360_v30 = vadd.f32 %v359_v27, %v1327_v2  ;;  %v406_v31 = vadd.f32 %v405_v28, %v1327_v2  ;;  %v552_v32 = vld [vmem:[#allocation3 + $0x28] sm:$0xff]  ;;  %v415_v33 = vpop.xlane.xlu1 %414  ;;  %v370_v36 = vpop.xlane.xlu2 %369 }
  0xcf   : > { %465 = vst.msk [vmem:[#allocation3 + $0x20] sm:$0xff] %vm376_vm2, %v463_v29  ;;  %580 = vperm.xlu0 %958, %v552_v32   ;;  %v419_v34 = vadd.f32 1.0, %v415_v33  ;;  %v374_v37 = vadd.f32 1.0, %v370_v36  ;;  %v548_v47 = vld [vmem:[#allocation3 + $0x8] sm:$0xff]  ;;  %v1443_v33 = vperm.slane %v478_v18, 0 }
  0xd0   : > { %366 = vst.msk [vmem:[#allocation2] sm:$0xff] %vm365_vm1, %v360_v30  ;;  %v550_v35 = vld [vmem:[#allocation3 + $0x18] sm:$0xff] }
  0xd1   : > { %411 = vst.msk [vmem:[#allocation2 + $0x10] sm:$0xff] %vm365_vm1, %v406_v31  ;;  %570 = vperm.xlu2 %960, %v550_v35  }
  0xd2   : > { %421 = vst.msk [vmem:[#allocation3 + $0x10] sm:$0xff] %vm376_vm2, %v419_v34 }
  0xd3   : > { %377 = vst.msk [vmem:[#allocation3] sm:$0xff] %vm376_vm2, %v374_v37 }
  0xd5   : > { %v362_v38 = vpop.f32.mrf.mxu0  ;;  %v408_v39 = vpop.f32.mrf.mxu1 }
  0xd6   : > { %v363_v40 = vadd.f32 %v362_v38, %v1325_v1  ;;  %v409_v41 = vadd.f32 %v408_v39, %v1325_v1  ;;  %v449_v42 = vpop.f32.mrf.mxu2  ;;  %v551_v43 = vld [vmem:[#allocation3 + $0x20] sm:$0xff] }
  0xd7   : > { %v450_v44 = vadd.f32 %v449_v42, %v1327_v2  ;;  %575 = vperm.xlu1 %959, %v551_v43   ;;  %v467_v45 = vld [vmem:[#allocation2] sm:$0xff] }
  0xd8   : > { %367 = vst.msk [vmem:[#allocation2 + $0x8] sm:$0xff] %vm365_vm1, %v363_v40  ;;  %866 = vmatmul.msk.f32.vlgmr.msrb.gmra.mxu1 %vm365_vm1, %v467_v45  ;;  %v469_v55 = vld [vmem:[#allocation2 + $0x10] sm:$0xff] }
  0xd9   : > { %412 = vst.msk [vmem:[#allocation2 + $0x18] sm:$0xff] %vm365_vm1, %v409_v41  ;;  %v549_v46 = vld [vmem:[#allocation3 + $0x10] sm:$0xff] }
  0xda   : > { %455 = vst.msk [vmem:[#allocation2 + $0x20] sm:$0xff] %vm365_vm1, %v450_v44  ;;  %565 = vperm.xlu2 %960, %v549_v46   ;;  %v547_v51 = vld [vmem:[#allocation3] sm:$0xff] }
  0xde   : > { %v452_v48 = vpop.f32.mrf.mxu2 }
  0xdf   : > { %v468_v49 = vld [vmem:[#allocation2 + $0x8] sm:$0xff]  ;;  %v453_v50 = vadd.f32 %v452_v48, %v1325_v1  ;;  %560 = vperm.xlu1 %959, %v548_v47  }
  0xe0   : > { %867 = vmatmul.msk.f32.vlgmr.msrb.gmra.mxu2 %vm365_vm1, %v468_v49  ;;  %v470_v52 = vld [vmem:[#allocation2 + $0x18] sm:$0xff] }
  0xe1   : > { %869 = vmatmul.msk.f32.vlgmr.msra.gmra.mxu3 %vm365_vm1, %v470_v52  ;;  %456 = vst.msk [vmem:[#allocation2 + $0x28] sm:$0xff] %vm365_vm1, %v453_v50  ;;  %v471_v54 = vld [vmem:[#allocation2 + $0x20] sm:$0xff] }
  0xe2   : > { %555 = vperm.xlu2 %960, %v547_v51  }
  0xe7   : > { %683 = vperm.xlu1 %959, %v680_v53  }
  0xe8   : > { %868 = vmatmul.msk.f32.gmra.mxu2 %vm365_vm1, %v469_v55  ;;  %v472_v56 = vld [vmem:[#allocation2 + $0x28] sm:$0xff] }
  0xe9   : > { %870 = vmatmul.msk.f32.gmra.mxu3 %vm365_vm1, %v471_v54 }
  0xf1   : > { %871 = vmatmul.msk.f32.gmra.mxu3 %vm365_vm1, %v472_v56 }
 0x12b   : > { %v1383_v57 = vpop.permute.xlu2 %570 }
 0x12c   : > { %vm633_vm3 = vweird.f32 %v1383_v57  ;;  %v637_v30 = vand.u32 2147483647, %v1383_v57  ;;  %v639_v35 = vand.u32 2147483648, %v1383_v57 }
 0x12e   : > { %vm1468_vm15 = vcmp.eq.f32.partialorder %v637_v30, 8.507059e+37  ;;  %v640_v46 = vor.u32 1.1754944e-38, %v639_v35 }
 0x134   : > { %v1386_v60 = vpop.permute.xlu2 %565 }
 0x135   : > { %vm618_vm14 = vweird.f32 %v1386_v60  ;;  %v624_v50 = vand.u32 2147483648, %v1386_v60  ;;  %v622_v55 = vand.u32 2147483647, %v1386_v60 }
 0x13c   : > { %v1405_v6 = vpop.permute.xlu2 %555 }
 0x141   : > { %v581_v58 = vpop.permute.xlu0 %580 }
 0x142   : > { %961 = vrcp.f32 %v581_v58  ;;  %vm663_vm4 = vweird.f32 %v581_v58  ;;  %v667_v19 = vand.u32 2147483647, %v581_v58  ;;  %v669_v20 = vand.u32 2147483648, %v581_v58 }
 0x144   : > { %v670_v36 = vor.u32 1.1754944e-38, %v669_v20  ;;  %vm1454_vm12 = vcmp.eq.f32.partialorder %v667_v19, 8.507059e+37 }
 0x148   : > { %v1388_v61 = vpop.eup %961 }
 0x149   : > { %v576_v59 = vpop.permute.xlu1 %575  ;;  %v659_v0 = vmul.f32 %v1388_v61, %v581_v58  ;;  %vm664_vm5 = vweird.f32 %v1388_v61 }
 0x14a   : > { %963 = vrcp.f32 %v576_v59  ;;  %vm648_vm6 = vweird.f32 %v576_v59  ;;  %v654_v21 = vand.u32 2147483648, %v576_v59  ;;  %vm1425_vm9 = vmor %vm663_vm4, %vm664_vm5  ;;  %v652_v26 = vand.u32 2147483647, %v576_v59 }
 0x14b   : > { %965 = vrcp.f32 %v1383_v57  ;;  %v660_v7 = vsub.f32 1.0, %v659_v0  ;;  %vm623_vm5 = vcmp.eq.f32.partialorder %v622_v55, 8.507059e+37 }
 0x14c   : > { %967 = vrcp.f32 %v1386_v60  ;;  %v655_v38 = vor.u32 1.1754944e-38, %v654_v21  ;;  %vm653_vm13 = vcmp.eq.f32.partialorder %v652_v26, 8.507059e+37 }
 0x14d   : > { %v661_v12 = vmul.f32 %v1388_v61, %v660_v7 }
 0x14f   : > { %v662_v27 = vadd.f32 %v1388_v61, %v661_v12 }
 0x150   : > { %v1390_v62 = vpop.eup %963 }
 0x151   : > { %v1393_v63 = vpop.eup %965  ;;  %v644_v1 = vmul.f32 %v1390_v62, %v576_v59  ;;  %v1397_v2 = vpop.permute.xlu1 %560  ;;  %vm649_vm7 = vweird.f32 %v1390_v62  ;;  %v666_v42 = vsel %vm1425_vm9, %v1388_v61, %v662_v27 }
 0x152   : > { %v629_v3 = vmul.f32 %v1393_v63, %v1383_v57  ;;  %v1403_v5 = vpop.eup %967  ;;  %969 = vrcp.f32 %v1397_v2  ;;  %vm634_vm8 = vweird.f32 %v1393_v63  ;;  %vm1438_vm10 = vmor %vm648_vm6, %vm649_vm7  ;;  %v671_v52 = vsel %vm1454_vm12, %v670_v36, %v666_v42 }
 0x153   : > { %v645_v8 = vsub.f32 1.0, %v644_v1  ;;  %v614_v10 = vmul.f32 %v1403_v5, %v1386_v60  ;;  %971 = vrcp.f32 %v1405_v6  ;;  %vm1447_vm11 = vmor %vm633_vm3, %vm634_vm8  ;;  %vm619_vm0 = vweird.f32 %v1403_v5 }
 0x154   : > { %v630_v9 = vsub.f32 1.0, %v629_v3  ;;  %vm603_vm2 = vweird.f32 %v1397_v2  ;;  %vm1484_vm3 = vmor %vm618_vm14, %vm619_vm0  ;;  %v625_v60 = vor.u32 1.1754944e-38, %v624_v50  ;;  %v607_v7 = vand.u32 2147483647, %v1397_v2 }
 0x155   : > { %v646_v13 = vmul.f32 %v1390_v62, %v645_v8  ;;  %v615_v17 = vsub.f32 1.0, %v614_v10  ;;  %vm588_vm6 = vweird.f32 %v1405_v6  ;;  %v529_v23 = vpop.f32.mrf.mxu1  ;;  %vm728_vm12 = vcmask 385024  }
 0x156   : > { %v631_v15 = vmul.f32 %v1393_v63, %v630_v9  ;;  %vm608_vm9 = vcmp.eq.f32.partialorder %v607_v7, 8.507059e+37 }
 0x157   : > { %v647_v25 = vadd.f32 %v1390_v62, %v646_v13  ;;  %v616_v32 = vmul.f32 %v1403_v5, %v615_v17 }
 0x158   : > { %v1416_v14 = vpop.eup %969  ;;  %v632_v29 = vadd.f32 %v1393_v63, %v631_v15  ;;  %v592_v15 = vand.u32 2147483647, %v1405_v6 }
 0x159   : > { %v1423_v22 = vpop.eup %971  ;;  %v599_v24 = vmul.f32 %v1416_v14, %v1397_v2  ;;  %v651_v41 = vsel %vm1438_vm10, %v1390_v62, %v647_v25  ;;  %v617_v54 = vadd.f32 %v1403_v5, %v616_v32  ;;  %vm604_vm4 = vweird.f32 %v1416_v14  ;;  %v684_v30 = vpop.permute.xlu1 %683 }
 0x15a   : > { %v584_v37 = vmul.f32 %v1423_v22, %v1405_v6  ;;  %v636_v43 = vsel %vm1447_vm11, %v1393_v63, %v632_v29  ;;  %v656_v51 = vsel %vm653_vm13, %v655_v38, %v651_v41  ;;  %v609_v63 = vand.u32 2147483648, %v1397_v2  ;;  %vm1506_vm7 = vmor %vm603_vm2, %vm604_vm4 }
 0x15b   : > { %v600_v40 = vsub.f32 1.0, %v599_v24  ;;  %v641_v0 = vsel %vm1468_vm15, %v640_v46, %v636_v43  ;;  %v621_v8 = vsel %vm1484_vm3, %v1403_v5, %v617_v54  ;;  %vm589_vm8 = vweird.f32 %v1423_v22 }
 0x15c   : > { %v585_v49 = vsub.f32 1.0, %v584_v37  ;;  %v594_v5 = vand.u32 2147483648, %v1405_v6  ;;  %v610_v12 = vor.u32 1.1754944e-38, %v609_v63  ;;  %v626_v13 = vsel %vm623_vm5, %v625_v60, %v621_v8  ;;  %vm590_vm10 = vmor %vm588_vm6, %vm589_vm8 }
 0x15d   : > { %v601_v53 = vmul.f32 %v1416_v14, %v600_v40  ;;  %vm593_vm11 = vcmp.eq.f32.partialorder %v592_v15, 8.507059e+37  ;;  %v530_v24 = vadd.f32 %v529_v23, %v1443_v33  ;;  %v686_v31 = vperm.slane %v684_v30, 0 }
 0x15e   : > { %v586_v62 = vmul.f32 %v1423_v22, %v585_v49  ;;  %v595_v20 = vor.u32 1.1754944e-38, %v594_v5 }
 0x15f   : > { %v602_v3 = vadd.f32 %v1416_v14, %v601_v53 }
 0x161   : > { %v606_v2 = vsel %vm1506_vm7, %v1416_v14, %v602_v3 }
 0x162   : > { %v611_v21 = vsel %vm608_vm9, %v610_v12, %v606_v2 }
 0x163   : > { %v1433_v28 = vpop.f32.mrf.mxu2 }
 0x164   : > { %v1401_v4 = vpop.f32.mrf.mxu3  ;;  %v533_v17 = vadd.f32 %v1433_v28, %v1443_v33 }
 0x165   : > { %v539_v58 = vadd.f32 %v1401_v4, %v1443_v33 }
 0x166   : > { %v612_v14 = vmul.f32 %v611_v21, %v533_v17 }
 0x167   : > { %v642_v9 = vmul.f32 %v641_v0, %v539_v58 }
 0x168   : > { %v674_v27 = vmax.f32 %v612_v14, 0.0 }
 0x169   : > { %v676_v18 = vmax.f32 %v642_v9, 0.0 }
 0x16b   : > { %v535_v1 = vpop.f32.mrf.mxu2 }
 0x16c   : > { %v541_v16 = vpop.f32.mrf.mxu3  ;;  %v536_v10 = vadd.f32 %v535_v1, %v1443_v33 }
 0x16d   : > { %v542_v47 = vadd.f32 %v541_v16, %v1443_v33  ;;  %v587_v16 = vadd.f32 %v1423_v22, %v586_v62 }
 0x16e   : > { %v627_v19 = vmul.f32 %v626_v13, %v536_v10 }
 0x16f   : > { %v657_v59 = vmul.f32 %v656_v51, %v542_v47  ;;  %v591_v6 = vsel %vm590_vm10, %v1423_v22, %v587_v16  ;;  %v679_v22 = vld [vmem:[%s1569_s4] sm:$0x1] }
 0x170   : > { %v675_v25 = vmax.f32 %v627_v19, 0.0  ;;  %v596_v26 = vsel %vm593_vm11, %v595_v20, %v591_v6 }
 0x171   : > { %v677_v11 = vmax.f32 %v657_v59, 0.0  ;;  %v597_v28 = vmul.f32 %v596_v26, %v530_v24 }
 0x173   : > { %v673_v29 = vmax.f32 %v597_v28, 0.0 }
 0x174   : > { %v544_v45 = vpop.f32.mrf.mxu3 }
 0x175   : > { %v545_v48 = vadd.f32 %v544_v45, %v1443_v33 }
 0x177   : > { %v672_v56 = vmul.f32 %v671_v52, %v545_v48 }
 0x179   : > { %v678_v61 = vmax.f32 %v672_v56, 0.0 }
 0x17b   : > { %872 = vmatpush.xpose.msk.msrb.mxu0 %vm365_vm1, %v678_v61 }
 0x17f   : > { %873 = vmatpush.xpose.msk.msrb.mxu0 %vm365_vm1, %v677_v11 }
 0x183   : > { %874 = vmatpush.xpose.msk.msrb.mxu0 %vm365_vm1, %v676_v18 }
 0x187   : > { %875 = vmatpush.xpose.msk.msrb.mxu0 %vm365_vm1, %v675_v25 }
 0x18b   : > { %876 = vmatpush.xpose.msk.msrb.mxu0 %vm365_vm1, %v674_v27 }
 0x18f   : > { %877 = vmatpush.xpose.msk.msrb.mxu0 %vm365_vm1, %v673_v29 }
 0x192   : > { %878 = vmatmul.msk.f32.vlgmr.msrb.gmra.mxu0 %vm365_vm1, %v679_v22 }
 0x20f   : > { %v725_v32 = vpop.f32.mrf.mxu0 }
 0x210   : > { %v726_v33 = vadd.f32 %v725_v32, %v686_v31 }
 0x212   : > { %729 = vst.msk [vmem:[%s330_s30] sm:$0x1] %vm728_vm12, %v726_v33 }
 0x213   : > { %1090 = shalt.err (!%p1087_p2)
}
 0x214   : > { %901 = dma.vmem_to_hbm [thread:$0]  (%p1251_p7), %s742_s19, 16, %s744_s8, %s731_s17  }
 0x215 PF: > { %s755_s2 = sand.u32 1, %s1125_s23   ;;  %p1607_p12 = scmp.ge.s32.totalorder %s1137_s26, 2 }
 0x216   : > { %s756_s9 = scalar_lea.sflag [#allocation7], %s755_s2 }
 0x217   : > { %p915_p13 = pnand %p1607_p12, %p1216_p6 }
 0x219   : > { %p916_p0 = pneg %p915_p13 }
 0x21b   : > { %1120 = dma.done.wait (%p916_p0), %s756_s9, 16  }
 0x21c   : > { %1122 = vsyncadd (%p916_p0), %s756_s9, 4294967280  ;;  %s1608_s26 = sld [smem:[#allocation17_spill]]  ;;  %s1611_s23 = smov %s1129_s24 }
 0x21d   : > { %s1609_s7 = sld [smem:[#allocation16_spill]] }
 0x21e   : > { %s1610_s25 = sld [smem:[#allocation18_spill]] }
 0x222   : > { %p24_p3 = scmp.ge.s32.totalorder %s1608_s26, 4  }
 0x223   : > { %s1612_s24 = smov %s1609_s7 }
 0x224   :  { %26 = sbr.rel (!%p24_p3) target bundleno = 10 (0xa), region = 108 }
 0x229   :  { %761 = vsyncpa [#allocation6], 1 }
 0x22a   :  { %763 = vsyncpa [#allocation6 + $0x1], 1 }
 0x22b   :  { %764 = vsyncpa [#allocation9], 1 }
 0x22c   :  { %766 = vsyncpa [#allocation9 + $0x1], 1 }
 0x22d   :  { %767 = vsyncpa [#allocation7], 1 }
 0x22e   :  { %769 = vsyncpa [#allocation7 + $0x1], 1 }

</bundles_post_ra>
